<compile_context>
chip_gen: v7x
topology: tpu7x:2x2x1
jax: 0.10.0
libtpu: 0.0.40
codegen_flags: <defaults>
</compile_context>

<pallas_src>
import functools

import jax
import jax.numpy as jnp
import numpy as np
from jax import lax
from jax.experimental import pallas as pl
from jax.experimental.pallas import tpu as pltpu

LANES = 128
SUBLANES = 8
NSPLIT = 2                          # leading "parallel" grid axis (megacore on v7x)
TEMP_F32_ROWS = 6                   # est. live (tr, LANES) f32 temporaries in the body
VMEM_BUDGET = 40 * 1024 * 1024      # target working set (v7x: 64 MiB VMEM per TC)
VMEM_LIMIT_CAP = 48 * 1024 * 1024


def _cdiv(a, b):
    return -(-a // b)


def _round_up(a, b):
    return _cdiv(a, b) * b


def _fused_kernel(label_ref, soft_ref, *rest, rows, tr, bps, num_p):
    """One streaming pass: accumulate pos/neg and per-prediction class sums.

    Output block layout (rows of 8, lane-dense):
      [0:8]  pos partials, [8:16] neg partials,
      [16+16p : 24+16p]  S1 partials for prediction p,
      [24+16p : 32+16p]  S0 partials for prediction p.
    """
    pred_refs, out_ref = rest[:num_p], rest[num_p]

    @pl.when(pl.program_id(1) == 0)
    def _():
        out_ref[...] = jnp.zeros_like(out_ref)

    # Global row-block index.  The parallel 's' axis only partitions the block
    # range; the index_map clamps out-of-range duplicates and we zero them here
    # (valid_rows <= 0).  The last real block may also be ragged (valid_rows < tr).
    g = pl.program_id(0) * bps + pl.program_id(1)
    valid_rows = rows - g * tr

    lab = label_ref[...]                 # f32 values {0,1,2}; OOB rows hold garbage
    soft = soft_ref[...]

    row_idx = lax.broadcasted_iota(jnp.int32, (tr, LANES), 0)
    valid = row_idx < valid_rows         # (tr, LANES) bool

    # Use where-selects (NOT multiplies by an indicator): OOB garbage may be
    # NaN/Inf and 0*NaN = NaN, but select never propagates the unselected branch.
    is1 = jnp.logical_and(valid, lab == 1.0)
    is0 = jnp.logical_and(valid, lab == 0.0)

    def rsum8(x):
        # (tr, LANES) -> (8, LANES) sublane-group sum: VPU-only vreg adds, no
        # cross-sublane XLU reduce and no masked sub-tile stores.
        return jnp.sum(x.reshape(tr // SUBLANES, SUBLANES, LANES), axis=0)

    out_ref[0:8, :] += rsum8(jnp.where(valid, lab * soft, 0.0))
    out_ref[8:16, :] += rsum8(jnp.where(valid, (1.0 - lab) * (1.0 - soft), 0.0))

    one_m_soft = 1.0 - soft              # hoisted out of the per-prediction loop
    for p in range(num_p):               # static unroll over side outputs
        pred = pred_refs[p][...]
        logp = jnp.maximum(jnp.log(pred), -100.0)          # torch BCE clamps log at -100
        log1mp = jnp.maximum(jnp.log(1.0 - pred), -100.0)
        inner = soft * logp + one_m_soft * log1mp
        base = 16 + 16 * p
        out_ref[base:base + 8, :] += rsum8(jnp.where(is1, inner, 0.0))
        out_ref[base + 8:base + 16, :] += rsum8(jnp.where(is0, inner, 0.0))


def _tail_sums(lab_t, soft_t, pred_ts):
    """Plain-JAX partial sums for a <128-element lane tail (rare path)."""
    parts = [jnp.sum(lab_t * soft_t),
             jnp.sum((1.0 - lab_t) * (1.0 - soft_t))]
    for pt in pred_ts:
        logp = jnp.maximum(jnp.log(pt), -100.0)
        log1mp = jnp.maximum(jnp.log(1.0 - pt), -100.0)
        inner = soft_t * logp + (1.0 - soft_t) * log1mp
        parts.append(jnp.sum(jnp.where(lab_t == 1.0, inner, 0.0)))
        parts.append(jnp.sum(jnp.where(lab_t == 0.0, inner, 0.0)))
    return jnp.stack(parts).astype(jnp.float32)


def my_loss(edge_preds, edge_gt, edge_gt_soft, *, tile_rows=2048):
    """Pallas implementation of MyLoss.forward.

    edge_preds: list of arrays, each same shape as edge_gt (e.g. NCHW).
    Returns (bce_sum, {'bce': bce_sum}).
    """
    num_p = len(edge_preds)
    n_elems = int(np.prod(edge_gt.shape))
    nsums = 2 + 2 * num_p

    # Flatten without copying: reshape of a contiguous array is free and astype is
    # a no-op for f32 inputs.  (Previous version jnp.pad'ed EVERY tensor -> a full
    # hidden HBM read+write per tensor before the kernel even ran.)
    lab_flat = jnp.reshape(edge_gt, (-1,)).astype(jnp.float32)
    soft_flat = jnp.reshape(edge_gt_soft, (-1,)).astype(jnp.float32)
    pred_flat = [jnp.reshape(p, (-1,)).astype(jnp.float32) for p in edge_preds]

    rows = n_elems // LANES
    n_main = rows * LANES
    n_tail = n_elems - n_main

    sums = jnp.zeros((nsums,), jnp.float32)

    if rows > 0:
        # ---- tiling: large tiles, auto-shrunk to a v7x-safe VMEM working set ----
        in_streams = num_p + 2  # P preds + label + soft, all f32
        per_row_bytes = LANES * 4 * (2 * in_streams + TEMP_F32_ROWS)  # dbl-buffered in + temps
        tr = min(tile_rows, max(SUBLANES, VMEM_BUDGET // per_row_bytes))
        tr = max(SUBLANES, (tr // SUBLANES) * SUBLANES)
        tr = min(tr, _round_up(rows, SUBLANES))

        nb = _cdiv(rows, tr)            # total row blocks (last one may be ragged)
        bps = _cdiv(nb, NSPLIT)         # blocks per split — NO padding from the split
        grid = (NSPLIT, bps)

        def row_map(s, i):
            # Clamp duplicate trailing steps (when NSPLIT doesn't divide nb) to a
            # valid block; the kernel masks them out via valid_rows <= 0.
            return (jnp.minimum(s * bps + i, nb - 1), 0)

        def take_main(x):
            return (x if n_tail == 0 else x[:n_main]).reshape(rows, LANES)

        lab2d = take_main(lab_flat)
        soft2d = take_main(soft_flat)
        preds2d = [take_main(p) for p in pred_flat]

        out_rows = nsums * SUBLANES
        est_vmem = per_row_bytes * tr + 2 * NSPLIT * out_rows * LANES * 4
        vmem_limit = int(min(VMEM_LIMIT_CAP, max(32 << 20, est_vmem + (8 << 20))))

        kernel = functools.partial(_fused_kernel, rows=rows, tr=tr, bps=bps, num_p=num_p)

        out = pl.pallas_call(
            kernel,
            out_shape=jax.ShapeDtypeStruct((NSPLIT, out_rows, LANES), jnp.float32),
            grid_spec=pl.GridSpec(
                grid=grid,
                in_specs=([pl.BlockSpec((tr, LANES), row_map),      # label (f32, as-is)
                           pl.BlockSpec((tr, LANES), row_map)]      # soft
                          + [pl.BlockSpec((tr, LANES), row_map)     # each prediction
                             for _ in range(num_p)]),
                out_specs=pl.BlockSpec((None, out_rows, LANES), lambda s, i: (s, 0, 0))),
            compiler_params=pltpu.CompilerParams(
                dimension_semantics=("parallel", "arbitrary"),
                vmem_limit_bytes=vmem_limit),
        )(lab2d, soft2d, *preds2d)

        sums = sums + jnp.sum(out.reshape(NSPLIT, nsums, SUBLANES, LANES), axis=(0, 2, 3))

    if n_tail > 0:
        # <128-element lane tail handled in plain JAX instead of padding every tensor.
        sums = sums + _tail_sums(lab_flat[n_main:], soft_flat[n_main:],
                                 [p[n_main:] for p in pred_flat])

    num_pos, num_neg = sums[0], sums[1]
    s1, s0 = sums[2::2], sums[3::2]
    denom = num_pos + num_neg
    w1 = 1.0 * num_neg / denom
    w0 = 1.1 * num_pos / denom

    # Exact sequential semantics of the in-place reassignments
    #   mask[mask==1]=w1 ; mask[mask==0]=w0 ; mask[mask==2]=0
    # applied to the *scalar* per-class weights (covers the degenerate w1==0 and
    # weight==2 aliasing cascades without any per-element work).
    eff1 = w1
    eff1 = jnp.where(eff1 == 0.0, w0, eff1)
    eff1 = jnp.where(eff1 == 2.0, 0.0, eff1)
    eff0 = jnp.where(w0 == 2.0, 0.0, w0)
    # class-2 elements always end with weight 0 -> they never enter S1/S0.

    per_pred_mean = -(eff1 * s1 + eff0 * s0) / jnp.float32(n_elems)  # torch.mean(cost)
    bce_sum = jnp.sum(per_pred_mean)                                 # sum over the stack
    return bce_sum, {"bce": bce_sum}


# ---------------- pure-JAX reference (mirrors the PyTorch code) --------------
def _ref_single(pred, gt, gt_soft):
    lab = gt.astype(jnp.int32).astype(jnp.float32)
    num_pos = jnp.sum(lab * gt_soft)
    num_neg = jnp.sum((1.0 - lab) * (1.0 - gt_soft))
    w1 = num_neg / (num_pos + num_neg)
    w0 = 1.1 * num_pos / (num_pos + num_neg)
    mask = lab
    mask = jnp.where(mask == 1.0, w1, mask)
    mask = jnp.where(mask == 0.0, w0, mask)
    mask = jnp.where(mask == 2.0, 0.0, mask)
    logp = jnp.maximum(jnp.log(pred), -100.0)
    log1mp = jnp.maximum(jnp.log(1.0 - pred), -100.0)
    cost = -mask * (gt_soft * logp + (1.0 - gt_soft) * log1mp)
    return jnp.mean(cost)


def _ref_loss(edge_preds, gt, gt_soft):
    losses = jnp.stack([_ref_single(p.astype(jnp.float32),
                                    gt.astype(jnp.float32),
                                    gt_soft.astype(jnp.float32)) for p in edge_preds])
    return jnp.sum(losses)


if __name__ == "__main__":
    key = jax.random.PRNGKey(0)
    k_gt, k_soft, k_pred, k_gt2, k_soft2, k_pred2 = jax.random.split(key, 6)

    # ---- case 1: typical NCHW edge maps (lane-aligned) ----
    B, C, H, W = 2, 1, 32, 32
    P = 3  # number of side-output edge predictions
    edge_gt = jax.random.randint(k_gt, (B, C, H, W), 0, 3).astype(jnp.float32)  # {0,1,2}
    edge_gt_soft = jax.random.uniform(k_soft, (B, C, H, W), minval=0.0, maxval=1.0)
    edge_preds = [jax.random.uniform(pk, (B, C, H, W), minval=0.01, maxval=0.99)
                  for pk in jax.random.split(k_pred, P)]

    bce_sum, losses = my_loss(edge_preds, edge_gt, edge_gt_soft)
    bce_sum = jax.block_until_ready(bce_sum)
    ref = jax.block_until_ready(_ref_loss(edge_preds, edge_gt, edge_gt_soft))
    np.testing.assert_allclose(np.asarray(bce_sum), np.asarray(ref), rtol=1e-4, atol=1e-5)
    assert np.allclose(np.asarray(losses["bce"]), np.asarray(bce_sum))

    # ---- case 2: ragged shape (1200 = 9*128 + 48) — exercises in-kernel row
    # masking of the partial block and the plain-JAX lane-tail path (no padding). ----
    B2, C2, H2, W2 = 2, 1, 20, 30
    gt2 = jax.random.randint(k_gt2, (B2, C2, H2, W2), 0, 3).astype(jnp.float32)
    soft2 = jax.random.uniform(k_soft2, (B2, C2, H2, W2), minval=0.0, maxval=1.0)
    preds2 = [jax.random.uniform(pk, (B2, C2, H2, W2), minval=0.01, maxval=0.99)
              for pk in jax.random.split(k_pred2, P)]
    out2, _ = my_loss(preds2, gt2, soft2)
    out2 = jax.block_until_ready(out2)
    ref2 = jax.block_until_ready(_ref_loss(preds2, gt2, soft2))
    np.testing.assert_allclose(np.asarray(out2), np.asarray(ref2), rtol=1e-4, atol=1e-5)

    print("KERNEL_OK")
</pallas_src>

<mosaic_0001>
module attributes {stable_mosaic.version = 11 : i64} {
  func.func @_fused_kernel(%arg0: i32, %arg1: i32, %arg2: memref<16x128xf32, #tpu.memory_space<vmem>>, %arg3: memref<16x128xf32, #tpu.memory_space<vmem>>, %arg4: memref<16x128xf32, #tpu.memory_space<vmem>>, %arg5: memref<16x128xf32, #tpu.memory_space<vmem>>, %arg6: memref<16x128xf32, #tpu.memory_space<vmem>>, %arg7: memref<1x64x128xf32, #tpu.memory_space<vmem>>) attributes {dimension_semantics = [#tpu.dimension_semantics<parallel>, #tpu.dimension_semantics<arbitrary>], iteration_bounds = array<i64: 2, 1>, scalar_prefetch = 0 : i64, scratch_operands = 0 : i64, tpu.core_type = #tpu.core_type<tc>, window_params = [{transform_indices = @transform_0, window_bounds = array<i64: 16, 128>}, {transform_indices = @transform_1, window_bounds = array<i64: 16, 128>}, {transform_indices = @transform_2, window_bounds = array<i64: 16, 128>}, {transform_indices = @transform_3, window_bounds = array<i64: 16, 128>}, {transform_indices = @transform_4, window_bounds = array<i64: 16, 128>}, {transform_indices = @transform_5, window_bounds = array<i64: 1, 64, 128>}]} {
    %c0_i32 = arith.constant 0 : i32
    %0 = arith.cmpi eq, %arg1, %c0_i32 : i32
    %1 = arith.extui %0 : i1 to i32
    %c0_i32_0 = arith.constant 0 : i32
    %2 = arith.cmpi ne, %1, %c0_i32_0 : i32
    scf.if %2 {
      %cst_81 = arith.constant 0.000000e+00 : f32
      %142 = vector.broadcast %cst_81 : f32 to vector<64x128xf32>
      %c0_82 = arith.constant 0 : index
      %c0_83 = arith.constant 0 : index
      %c0_84 = arith.constant 0 : index
      %143 = vector.load %arg7[%c0_82, %c0_83, %c0_84] : memref<1x64x128xf32, #tpu.memory_space<vmem>>, vector<1x64x128xf32>
      %144 = vector.shape_cast %143 : vector<1x64x128xf32> to vector<64x128xf32>
      %145 = vector.shape_cast %142 : vector<64x128xf32> to vector<1x64x128xf32>
      tpu.vector_store %arg7[%c0_82, %c0_83, %c0_84], %145 {strides = array<i32>} : memref<1x64x128xf32, #tpu.memory_space<vmem>>, vector<1x64x128xf32>,
    } else {
    }
    %c1_i32 = arith.constant 1 : i32
    %3 = arith.muli %arg0, %c1_i32 : i32
    %4 = arith.addi %3, %arg1 : i32
    %c16_i32 = arith.constant 16 : i32
    %5 = arith.muli %4, %c16_i32 : i32
    %c16_i32_1 = arith.constant 16 : i32
    %6 = arith.subi %c16_i32_1, %5 : i32
    %c0 = arith.constant 0 : index
    %c0_2 = arith.constant 0 : index
    %7 = vector.load %arg2[%c0, %c0_2] : memref<16x128xf32, #tpu.memory_space<vmem>>, vector<16x128xf32>
    %c0_3 = arith.constant 0 : index
    %c0_4 = arith.constant 0 : index
    %8 = vector.load %arg3[%c0_3, %c0_4] : memref<16x128xf32, #tpu.memory_space<vmem>>, vector<16x128xf32>
    %9 = tpu.iota {dimensions = array<i32: 0>} : vector<16x128xi32>
    %10 = vector.broadcast %6 : i32 to vector<16x128xi32>
    %11 = arith.cmpi slt, %9, %10 : vector<16x128xi32>
    %cst = arith.constant 1.000000e+00 : f32
    %12 = vector.broadcast %cst : f32 to vector<16x128xf32>
    %13 = arith.cmpf oeq, %7, %12 : vector<16x128xf32>
    %14 = arith.andi %11, %13 : vector<16x128xi1>
    %cst_5 = arith.constant 0.000000e+00 : f32
    %15 = vector.broadcast %cst_5 : f32 to vector<16x128xf32>
    %16 = arith.cmpf oeq, %7, %15 : vector<16x128xf32>
    %17 = arith.andi %11, %16 : vector<16x128xi1>
    %c0_6 = arith.constant 0 : index
    %c0_7 = arith.constant 0 : index
    %c0_8 = arith.constant 0 : index
    %18 = vector.load %arg7[%c0_6, %c0_7, %c0_8] : memref<1x64x128xf32, #tpu.memory_space<vmem>>, vector<1x8x128xf32>
    %19 = vector.shape_cast %18 : vector<1x8x128xf32> to vector<8x128xf32>
    %20 = arith.mulf %7, %8 : vector<16x128xf32>
    %cst_9 = arith.constant 0.000000e+00 : f32
    %21 = vector.broadcast %cst_9 : f32 to vector<16x128xf32>
    %22 = arith.select %11, %20, %21 : vector<16x128xi1>, vector<16x128xf32>
    %23 = vector.shape_cast %22 : vector<16x128xf32> to vector<2x8x128xf32>
    %cst_10 = arith.constant dense<0.000000e+00> : vector<8x128xf32>
    %24 = vector.multi_reduction <add>, %23, %cst_10 [0] : vector<2x8x128xf32> to vector<8x128xf32>
    %25 = arith.addf %19, %24 : vector<8x128xf32>
    %c0_11 = arith.constant 0 : index
    %c0_12 = arith.constant 0 : index
    %c0_13 = arith.constant 0 : index
    %26 = vector.load %arg7[%c0_11, %c0_12, %c0_13] : memref<1x64x128xf32, #tpu.memory_space<vmem>>, vector<1x8x128xf32>
    %27 = vector.shape_cast %26 : vector<1x8x128xf32> to vector<8x128xf32>
    %28 = vector.shape_cast %25 : vector<8x128xf32> to vector<1x8x128xf32>
    tpu.vector_store %arg7[%c0_11, %c0_12, %c0_13], %28 {strides = array<i32>} : memref<1x64x128xf32, #tpu.memory_space<vmem>>, vector<1x8x128xf32>,
    %c0_14 = arith.constant 0 : index
    %c8 = arith.constant 8 : index
    %c0_15 = arith.constant 0 : index
    %29 = vector.load %arg7[%c0_14, %c8, %c0_15] : memref<1x64x128xf32, #tpu.memory_space<vmem>>, vector<1x8x128xf32>
    %30 = vector.shape_cast %29 : vector<1x8x128xf32> to vector<8x128xf32>
    %cst_16 = arith.constant 1.000000e+00 : f32
    %31 = vector.broadcast %cst_16 : f32 to vector<16x128xf32>
    %32 = arith.subf %31, %7 : vector<16x128xf32>
    %cst_17 = arith.constant 1.000000e+00 : f32
    %33 = vector.broadcast %cst_17 : f32 to vector<16x128xf32>
    %34 = arith.subf %33, %8 : vector<16x128xf32>
    %35 = arith.mulf %32, %34 : vector<16x128xf32>
    %cst_18 = arith.constant 0.000000e+00 : f32
    %36 = vector.broadcast %cst_18 : f32 to vector<16x128xf32>
    %37 = arith.select %11, %35, %36 : vector<16x128xi1>, vector<16x128xf32>
    %38 = vector.shape_cast %37 : vector<16x128xf32> to vector<2x8x128xf32>
    %cst_19 = arith.constant dense<0.000000e+00> : vector<8x128xf32>
    %39 = vector.multi_reduction <add>, %38, %cst_19 [0] : vector<2x8x128xf32> to vector<8x128xf32>
    %40 = arith.addf %30, %39 : vector<8x128xf32>
    %c0_20 = arith.constant 0 : index
    %c8_21 = arith.constant 8 : index
    %c0_22 = arith.constant 0 : index
    %41 = vector.load %arg7[%c0_20, %c8_21, %c0_22] : memref<1x64x128xf32, #tpu.memory_space<vmem>>, vector<1x8x128xf32>
    %42 = vector.shape_cast %41 : vector<1x8x128xf32> to vector<8x128xf32>
    %43 = vector.shape_cast %40 : vector<8x128xf32> to vector<1x8x128xf32>
    tpu.vector_store %arg7[%c0_20, %c8_21, %c0_22], %43 {strides = array<i32>} : memref<1x64x128xf32, #tpu.memory_space<vmem>>, vector<1x8x128xf32>,
    %cst_23 = arith.constant 1.000000e+00 : f32
    %44 = vector.broadcast %cst_23 : f32 to vector<16x128xf32>
    %45 = arith.subf %44, %8 : vector<16x128xf32>
    %c0_24 = arith.constant 0 : index
    %c0_25 = arith.constant 0 : index
    %46 = vector.load %arg4[%c0_24, %c0_25] : memref<16x128xf32, #tpu.memory_space<vmem>>, vector<16x128xf32>
    %47 = math.log %46 : vector<16x128xf32>
    %cst_26 = arith.constant -1.000000e+02 : f32
    %48 = vector.broadcast %cst_26 : f32 to vector<16x128xf32>
    %49 = arith.maximumf %47, %48 : vector<16x128xf32>
    %cst_27 = arith.constant 1.000000e+00 : f32
    %50 = vector.broadcast %cst_27 : f32 to vector<16x128xf32>
    %51 = arith.subf %50, %46 : vector<16x128xf32>
    %52 = math.log %51 : vector<16x128xf32>
    %cst_28 = arith.constant -1.000000e+02 : f32
    %53 = vector.broadcast %cst_28 : f32 to vector<16x128xf32>
    %54 = arith.maximumf %52, %53 : vector<16x128xf32>
    %55 = arith.mulf %8, %49 : vector<16x128xf32>
    %56 = arith.mulf %45, %54 : vector<16x128xf32>
    %57 = arith.addf %55, %56 : vector<16x128xf32>
    %c0_29 = arith.constant 0 : index
    %c16 = arith.constant 16 : index
    %c0_30 = arith.constant 0 : index
    %58 = vector.load %arg7[%c0_29, %c16, %c0_30] : memref<1x64x128xf32, #tpu.memory_space<vmem>>, vector<1x8x128xf32>
    %59 = vector.shape_cast %58 : vector<1x8x128xf32> to vector<8x128xf32>
    %cst_31 = arith.constant 0.000000e+00 : f32
    %60 = vector.broadcast %cst_31 : f32 to vector<16x128xf32>
    %61 = arith.select %14, %57, %60 : vector<16x128xi1>, vector<16x128xf32>
    %62 = vector.shape_cast %61 : vector<16x128xf32> to vector<2x8x128xf32>
    %cst_32 = arith.constant dense<0.000000e+00> : vector<8x128xf32>
    %63 = vector.multi_reduction <add>, %62, %cst_32 [0] : vector<2x8x128xf32> to vector<8x128xf32>
    %64 = arith.addf %59, %63 : vector<8x128xf32>
    %c0_33 = arith.constant 0 : index
    %c16_34 = arith.constant 16 : index
    %c0_35 = arith.constant 0 : index
    %65 = vector.load %arg7[%c0_33, %c16_34, %c0_35] : memref<1x64x128xf32, #tpu.memory_space<vmem>>, vector<1x8x128xf32>
    %66 = vector.shape_cast %65 : vector<1x8x128xf32> to vector<8x128xf32>
    %67 = vector.shape_cast %64 : vector<8x128xf32> to vector<1x8x128xf32>
    tpu.vector_store %arg7[%c0_33, %c16_34, %c0_35], %67 {strides = array<i32>} : memref<1x64x128xf32, #tpu.memory_space<vmem>>, vector<1x8x128xf32>,
    %c0_36 = arith.constant 0 : index
    %c24 = arith.constant 24 : index
    %c0_37 = arith.constant 0 : index
    %68 = vector.load %arg7[%c0_36, %c24, %c0_37] : memref<1x64x128xf32, #tpu.memory_space<vmem>>, vector<1x8x128xf32>
    %69 = vector.shape_cast %68 : vector<1x8x128xf32> to vector<8x128xf32>
    %cst_38 = arith.constant 0.000000e+00 : f32
    %70 = vector.broadcast %cst_38 : f32 to vector<16x128xf32>
    %71 = arith.select %17, %57, %70 : vector<16x128xi1>, vector<16x128xf32>
    %72 = vector.shape_cast %71 : vector<16x128xf32> to vector<2x8x128xf32>
    %cst_39 = arith.constant dense<0.000000e+00> : vector<8x128xf32>
    %73 = vector.multi_reduction <add>, %72, %cst_39 [0] : vector<2x8x128xf32> to vector<8x128xf32>
    %74 = arith.addf %69, %73 : vector<8x128xf32>
    %c0_40 = arith.constant 0 : index
    %c24_41 = arith.constant 24 : index
    %c0_42 = arith.constant 0 : index
    %75 = vector.load %arg7[%c0_40, %c24_41, %c0_42] : memref<1x64x128xf32, #tpu.memory_space<vmem>>, vector<1x8x128xf32>
    %76 = vector.shape_cast %75 : vector<1x8x128xf32> to vector<8x128xf32>
    %77 = vector.shape_cast %74 : vector<8x128xf32> to vector<1x8x128xf32>
    tpu.vector_store %arg7[%c0_40, %c24_41, %c0_42], %77 {strides = array<i32>} : memref<1x64x128xf32, #tpu.memory_space<vmem>>, vector<1x8x128xf32>,
    %c0_43 = arith.constant 0 : index
    %c0_44 = arith.constant 0 : index
    %78 = vector.load %arg5[%c0_43, %c0_44] : memref<16x128xf32, #tpu.memory_space<vmem>>, vector<16x128xf32>
    %79 = math.log %78 : vector<16x128xf32>
    %cst_45 = arith.constant -1.000000e+02 : f32
    %80 = vector.broadcast %cst_45 : f32 to vector<16x128xf32>
    %81 = arith.maximumf %79, %80 : vector<16x128xf32>
    %cst_46 = arith.constant 1.000000e+00 : f32
    %82 = vector.broadcast %cst_46 : f32 to vector<16x128xf32>
    %83 = arith.subf %82, %78 : vector<16x128xf32>
    %84 = math.log %83 : vector<16x128xf32>
    %cst_47 = arith.constant -1.000000e+02 : f32
    %85 = vector.broadcast %cst_47 : f32 to vector<16x128xf32>
    %86 = arith.maximumf %84, %85 : vector<16x128xf32>
    %87 = arith.mulf %8, %81 : vector<16x128xf32>
    %88 = arith.mulf %45, %86 : vector<16x128xf32>
    %89 = arith.addf %87, %88 : vector<16x128xf32>
    %c0_48 = arith.constant 0 : index
    %c32 = arith.constant 32 : index
    %c0_49 = arith.constant 0 : index
    %90 = vector.load %arg7[%c0_48, %c32, %c0_49] : memref<1x64x128xf32, #tpu.memory_space<vmem>>, vector<1x8x128xf32>
    %91 = vector.shape_cast %90 : vector<1x8x128xf32> to vector<8x128xf32>
    %cst_50 = arith.constant 0.000000e+00 : f32
    %92 = vector.broadcast %cst_50 : f32 to vector<16x128xf32>
    %93 = arith.select %14, %89, %92 : vector<16x128xi1>, vector<16x128xf32>
    %94 = vector.shape_cast %93 : vector<16x128xf32> to vector<2x8x128xf32>
    %cst_51 = arith.constant dense<0.000000e+00> : vector<8x128xf32>
    %95 = vector.multi_reduction <add>, %94, %cst_51 [0] : vector<2x8x128xf32> to vector<8x128xf32>
    %96 = arith.addf %91, %95 : vector<8x128xf32>
    %c0_52 = arith.constant 0 : index
    %c32_53 = arith.constant 32 : index
    %c0_54 = arith.constant 0 : index
    %97 = vector.load %arg7[%c0_52, %c32_53, %c0_54] : memref<1x64x128xf32, #tpu.memory_space<vmem>>, vector<1x8x128xf32>
    %98 = vector.shape_cast %97 : vector<1x8x128xf32> to vector<8x128xf32>
    %99 = vector.shape_cast %96 : vector<8x128xf32> to vector<1x8x128xf32>
    tpu.vector_store %arg7[%c0_52, %c32_53, %c0_54], %99 {strides = array<i32>} : memref<1x64x128xf32, #tpu.memory_space<vmem>>, vector<1x8x128xf32>,
    %c0_55 = arith.constant 0 : index
    %c40 = arith.constant 40 : index
    %c0_56 = arith.constant 0 : index
    %100 = vector.load %arg7[%c0_55, %c40, %c0_56] : memref<1x64x128xf32, #tpu.memory_space<vmem>>, vector<1x8x128xf32>
    %101 = vector.shape_cast %100 : vector<1x8x128xf32> to vector<8x128xf32>
    %cst_57 = arith.constant 0.000000e+00 : f32
    %102 = vector.broadcast %cst_57 : f32 to vector<16x128xf32>
    %103 = arith.select %17, %89, %102 : vector<16x128xi1>, vector<16x128xf32>
    %104 = vector.shape_cast %103 : vector<16x128xf32> to vector<2x8x128xf32>
    %cst_58 = arith.constant dense<0.000000e+00> : vector<8x128xf32>
    %105 = vector.multi_reduction <add>, %104, %cst_58 [0] : vector<2x8x128xf32> to vector<8x128xf32>
    %106 = arith.addf %101, %105 : vector<8x128xf32>
    %c0_59 = arith.constant 0 : index
    %c40_60 = arith.constant 40 : index
    %c0_61 = arith.constant 0 : index
    %107 = vector.load %arg7[%c0_59, %c40_60, %c0_61] : memref<1x64x128xf32, #tpu.memory_space<vmem>>, vector<1x8x128xf32>
    %108 = vector.shape_cast %107 : vector<1x8x128xf32> to vector<8x128xf32>
    %109 = vector.shape_cast %106 : vector<8x128xf32> to vector<1x8x128xf32>
    tpu.vector_store %arg7[%c0_59, %c40_60, %c0_61], %109 {strides = array<i32>} : memref<1x64x128xf32, #tpu.memory_space<vmem>>, vector<1x8x128xf32>,
    %c0_62 = arith.constant 0 : index
    %c0_63 = arith.constant 0 : index
    %110 = vector.load %arg6[%c0_62, %c0_63] : memref<16x128xf32, #tpu.memory_space<vmem>>, vector<16x128xf32>
    %111 = math.log %110 : vector<16x128xf32>
    %cst_64 = arith.constant -1.000000e+02 : f32
    %112 = vector.broadcast %cst_64 : f32 to vector<16x128xf32>
    %113 = arith.maximumf %111, %112 : vector<16x128xf32>
    %cst_65 = arith.constant 1.000000e+00 : f32
    %114 = vector.broadcast %cst_65 : f32 to vector<16x128xf32>
    %115 = arith.subf %114, %110 : vector<16x128xf32>
    %116 = math.log %115 : vector<16x128xf32>
    %cst_66 = arith.constant -1.000000e+02 : f32
    %117 = vector.broadcast %cst_66 : f32 to vector<16x128xf32>
    %118 = arith.maximumf %116, %117 : vector<16x128xf32>
    %119 = arith.mulf %8, %113 : vector<16x128xf32>
    %120 = arith.mulf %45, %118 : vector<16x128xf32>
    %121 = arith.addf %119, %120 : vector<16x128xf32>
    %c0_67 = arith.constant 0 : index
    %c48 = arith.constant 48 : index
    %c0_68 = arith.constant 0 : index
    %122 = vector.load %arg7[%c0_67, %c48, %c0_68] : memref<1x64x128xf32, #tpu.memory_space<vmem>>, vector<1x8x128xf32>
    %123 = vector.shape_cast %122 : vector<1x8x128xf32> to vector<8x128xf32>
    %cst_69 = arith.constant 0.000000e+00 : f32
    %124 = vector.broadcast %cst_69 : f32 to vector<16x128xf32>
    %125 = arith.select %14, %121, %124 : vector<16x128xi1>, vector<16x128xf32>
    %126 = vector.shape_cast %125 : vector<16x128xf32> to vector<2x8x128xf32>
    %cst_70 = arith.constant dense<0.000000e+00> : vector<8x128xf32>
    %127 = vector.multi_reduction <add>, %126, %cst_70 [0] : vector<2x8x128xf32> to vector<8x128xf32>
    %128 = arith.addf %123, %127 : vector<8x128xf32>
    %c0_71 = arith.constant 0 : index
    %c48_72 = arith.constant 48 : index
    %c0_73 = arith.constant 0 : index
    %129 = vector.load %arg7[%c0_71, %c48_72, %c0_73] : memref<1x64x128xf32, #tpu.memory_space<vmem>>, vector<1x8x128xf32>
    %130 = vector.shape_cast %129 : vector<1x8x128xf32> to vector<8x128xf32>
    %131 = vector.shape_cast %128 : vector<8x128xf32> to vector<1x8x128xf32>
    tpu.vector_store %arg7[%c0_71, %c48_72, %c0_73], %131 {strides = array<i32>} : memref<1x64x128xf32, #tpu.memory_space<vmem>>, vector<1x8x128xf32>,
    %c0_74 = arith.constant 0 : index
    %c56 = arith.constant 56 : index
    %c0_75 = arith.constant 0 : index
    %132 = vector.load %arg7[%c0_74, %c56, %c0_75] : memref<1x64x128xf32, #tpu.memory_space<vmem>>, vector<1x8x128xf32>
    %133 = vector.shape_cast %132 : vector<1x8x128xf32> to vector<8x128xf32>
    %cst_76 = arith.constant 0.000000e+00 : f32
    %134 = vector.broadcast %cst_76 : f32 to vector<16x128xf32>
    %135 = arith.select %17, %121, %134 : vector<16x128xi1>, vector<16x128xf32>
    %136 = vector.shape_cast %135 : vector<16x128xf32> to vector<2x8x128xf32>
    %cst_77 = arith.constant dense<0.000000e+00> : vector<8x128xf32>
    %137 = vector.multi_reduction <add>, %136, %cst_77 [0] : vector<2x8x128xf32> to vector<8x128xf32>
    %138 = arith.addf %133, %137 : vector<8x128xf32>
    %c0_78 = arith.constant 0 : index
    %c56_79 = arith.constant 56 : index
    %c0_80 = arith.constant 0 : index
    %139 = vector.load %arg7[%c0_78, %c56_79, %c0_80] : memref<1x64x128xf32, #tpu.memory_space<vmem>>, vector<1x8x128xf32>
    %140 = vector.shape_cast %139 : vector<1x8x128xf32> to vector<8x128xf32>
    %141 = vector.shape_cast %138 : vector<8x128xf32> to vector<1x8x128xf32>
    tpu.vector_store %arg7[%c0_78, %c56_79, %c0_80], %141 {strides = array<i32>} : memref<1x64x128xf32, #tpu.memory_space<vmem>>, vector<1x8x128xf32>,
    return
  }
  func.func @transform_0(%arg0: i32, %arg1: i32) -> (i32, i32) {
    %c1_i32 = arith.constant 1 : i32
    %0 = arith.muli %arg0, %c1_i32 : i32
    %1 = arith.addi %0, %arg1 : i32
    %c0_i32 = arith.constant 0 : i32
    %2 = arith.minsi %1, %c0_i32 : i32
    %c0_i32_0 = arith.constant 0 : i32
    %c0_i32_1 = arith.constant 0 : i32
    return %2, %c0_i32_0 : i32, i32
  }
  func.func @transform_1(%arg0: i32, %arg1: i32) -> (i32, i32) {
    %c1_i32 = arith.constant 1 : i32
    %0 = arith.muli %arg0, %c1_i32 : i32
    %1 = arith.addi %0, %arg1 : i32
    %c0_i32 = arith.constant 0 : i32
    %2 = arith.minsi %1, %c0_i32 : i32
    %c0_i32_0 = arith.constant 0 : i32
    %c0_i32_1 = arith.constant 0 : i32
    return %2, %c0_i32_0 : i32, i32
  }
  func.func @transform_2(%arg0: i32, %arg1: i32) -> (i32, i32) {
    %c1_i32 = arith.constant 1 : i32
    %0 = arith.muli %arg0, %c1_i32 : i32
    %1 = arith.addi %0, %arg1 : i32
    %c0_i32 = arith.constant 0 : i32
    %2 = arith.minsi %1, %c0_i32 : i32
    %c0_i32_0 = arith.constant 0 : i32
    %c0_i32_1 = arith.constant 0 : i32
    return %2, %c0_i32_0 : i32, i32
  }
  func.func @transform_3(%arg0: i32, %arg1: i32) -> (i32, i32) {
    %c1_i32 = arith.constant 1 : i32
    %0 = arith.muli %arg0, %c1_i32 : i32
    %1 = arith.addi %0, %arg1 : i32
    %c0_i32 = arith.constant 0 : i32
    %2 = arith.minsi %1, %c0_i32 : i32
    %c0_i32_0 = arith.constant 0 : i32
    %c0_i32_1 = arith.constant 0 : i32
    return %2, %c0_i32_0 : i32, i32
  }
  func.func @transform_4(%arg0: i32, %arg1: i32) -> (i32, i32) {
    %c1_i32 = arith.constant 1 : i32
    %0 = arith.muli %arg0, %c1_i32 : i32
    %1 = arith.addi %0, %arg1 : i32
    %c0_i32 = arith.constant 0 : i32
    %2 = arith.minsi %1, %c0_i32 : i32
    %c0_i32_0 = arith.constant 0 : i32
    %c0_i32_1 = arith.constant 0 : i32
    return %2, %c0_i32_0 : i32, i32
  }
  func.func @transform_5(%arg0: i32, %arg1: i32) -> (i32, i32, i32) {
    %c0_i32 = arith.constant 0 : i32
    %c0_i32_0 = arith.constant 0 : i32
    %c0_i32_1 = arith.constant 0 : i32
    return %arg0, %c0_i32, %c0_i32_0 : i32, i32, i32
  }
}

</mosaic_0001>

<bundles_post_ra>
// kernel: tpu_custom_call.1
= control target key start
LH: loop header
LB: loop body
LE: loop exit
PB: predicated region body
PF: predicated region fallthrough
CT: control target
= control target key end

     0   :  { %s1720_s0 = inlined_call_operand.hbm [shape: f32[16,128], index: 0, kind: input, shape index: {}]   ;;  %s1721_s1 = inlined_call_operand.hbm [shape: f32[16,128], index: 1, kind: input, shape index: {}]   ;;  %s1722_s2 = inlined_call_operand.hbm [shape: f32[16,128], index: 2, kind: input, shape index: {}]   ;;  %s1723_s3 = inlined_call_operand.hbm [shape: f32[16,128], index: 3, kind: input, shape index: {}]   ;;  %s1724_s4 = inlined_call_operand.hbm [shape: f32[16,128], index: 4, kind: input, shape index: {}]   ;;  %s1725_s5 = inlined_call_operand.hbm [shape: f32[2,64,128], index: 5, kind: output, shape index: {}]  }
   0x1   :  { %1735 = sst [smem:[#allocation22_spill]] %s1721_s1 }
   0x2   :  { %10 = vsyncpa [#allocation3], 0 }
   0x3   :  { %12 = vsyncpa [#allocation3 + $0x1], 0 }
   0x4   :  { %13 = vsyncpa [#allocation6], 0 }
   0x5   :  { %15 = vsyncpa [#allocation6 + $0x1], 0 }
   0x6   :  { %16 = vsyncpa [#allocation9], 0 }
   0x7   :  { %18 = vsyncpa [#allocation9 + $0x1], 0 }
   0x8   :  { %19 = vsyncpa [#allocation4], 0 }
   0x9   :  { %21 = vsyncpa [#allocation4 + $0x1], 0  ;;  %s1286_s18 = smov 0   ;;  %s1288_s19 = smov 0  }
   0xa   :  { %s1290_s20 = smov 0   ;;  %s1292_s21 = smov 0  }
   0xb   :  { %s1294_s22 = smov 0   ;;  %s1296_s23 = smov 0  }
   0xc   :  { %s1298_s24 = smov 0   ;;  %s1300_s25 = smov 0  }
   0xd LB: > { %1736 = sst [smem:[#allocation16_spill]] %s1216_s18  ;;  %s1325_s26 = sadd.s32 4294967295, %s1244_s25   ;;  %s1244_s25 = sphi %s1300_s25, %s27_s25   ;;  %s1240_s24 = sphi %s1298_s24, %s1777_s24   ;;  %s1236_s23 = sphi %s1296_s23, %s1776_s23   ;;  %s1232_s22 = sphi %s1294_s22, %s1710_s22   ;;  %s1228_s21 = sphi %s1292_s21, %s1780_s21   ;;  %s1224_s20 = sphi %s1290_s20, %s1775_s20   ;;  %s1220_s19 = sphi %s1288_s19, %s1779_s19   ;;  %s1216_s18 = sphi %s1286_s18, %s1778_s18  }
   0xe   : > { %1737 = sst [smem:[#allocation17_spill]] %s1224_s20  ;;  %s811_s27 = sadd.s32 4294967294, %s1244_s25  }
   0xf   : > { %1738 = sst [smem:[#allocation18_spill]] %s1240_s24  ;;  %s39_s28 = sadd.s32 1, %s1240_s24 }
  0x10   : > { %p41_p0 = scmp.ge.s32.totalorder %s39_s28, 2  ;;  %p1213_p1 = scmp.ne.s32.totalorder %s1232_s22, 0 }
  0x11   : > { %p60_p2 = scmp.eq.s32.totalorder %s1244_s25, 0  ;;  %p65_p3 = scmp.ne.s32.totalorder %s1232_s22, %s1228_s21 }
  0x12   : > { %s1782_s28 = smov (%p41_p0, %s39_s28), 0  ;;  %p66_p5 = scmp.eq.s32.totalorder %s1325_s26, 0 }
  0x13   : > { %1739 = sst [smem:[#allocation19_spill]] %s1782_s28  ;;  %p1334_p4 = por %p1213_p1, %p60_p2 }
  0x14   : > { %p1339_p6 = por %p66_p5, %p65_p3  ;;  %s203_s6 = ssub.s32 %s1240_s24, %s1782_s28 }
  0x15   : > { %p204_p7 = scmp.eq.s32.totalorder %s203_s6, 0  ;;  %s206_s7 = sadd.s32 1, %s1224_s20 }
  0x16   : > { %s1741_s30 = scalar_select %p1339_p6, 1, 0 }
  0x17   : > { %s1347_s8 = scalar_select %p204_p7, %s1224_s20, %s206_s7  }
  0x18   : > { %p216_p8 = scmp.ne.s32.totalorder %s1224_s20, %s1220_s19  ;;  %p217_p9 = scmp.eq.s32.totalorder %s1325_s26, 1 }
  0x19   : > { %1742 = sst [smem:[#allocation20_spill]] %s1347_s8  ;;  %p222_p10 = scmp.ne.s32.totalorder %s1220_s19, %s1216_s18 }
  0x1a   : > { %p223_p11 = scmp.eq.s32.totalorder %s811_s27, 1  ;;  %p1354_p12 = por %p217_p9, %p216_p8 }
  0x1b   : > { %p880_p1 = scmp.lt.s32.totalorder %s1244_s25, 2  ;;  %s267_s12 = sand.u32 1, %s1244_s25  }
  0x1c   : > { %s1743_s9 = scalar_select %p1354_p12, 1, 0 }
  0x1d   : > { %p1359_p0 = por %p223_p11, %p222_p10  ;;  %p1366_p2 = pnand %p880_p1, %p1334_p4 }
  0x1e   : > { %s1246_s13 = smov [#allocation5]   ;;  %s1376_s15 = scalar_lea.sflag [#allocation6], %s267_s12 }
  0x1f   : > { %s1744_s10 = scalar_select %p1359_p0, 1, 0 }
  0x20   : > { %s1746_s11 = scalar_select %p1366_p2, 1, 0 }
  0x21   : > { %1745 = sst [smem:[#allocation21_spill]] %s1744_s10  ;;  %s281_s14 = sshll.u32 %s1246_s13, 4  ;;  %s1371_s14 = int_to_ptr.vmem [resolvable:$true] %s281_s14 }
  0x22   : > { %s1747_s1 = sld [smem:[#allocation22_spill]]  ;;  %p1386_p5 = pneg %p1366_p2 }
  0x28   : > { %s983_s21 = scalar_lea.hbm %s1747_s1, 256 }
  0x29   : > { %p984_p4 = scmp.ne.s32.totalorder %s1747_s1, %s983_s21  ;;  %p990_p9 = scmp.lt.u32.totalorder %s983_s21, %s983_s21 }
  0x2a   : > { %p992_p10 = scmp.lt.u32.totalorder %s983_s21, %s1747_s1 }
  0x2b   : > { %p986_p7 = pnand %p1386_p5, %p984_p4 }
  0x2c   : > { %p993_p11 = por %p992_p10, %p990_p9 }
  0x2d   : > { %p987_p8 = pneg %p986_p7 }
  0x2f   : > { %p994_p1 = pnand %p993_p11, %p987_p8 }
  0x31   : > { %997 = shalt.err (!%p994_p1)
}
  0x32   : > { %s998_s16 = scalar_lea.vmem %s1371_s14, 256  ;;  %s1005_s17 = scalar_lea.vmem %s1371_s14, 512 }
  0x33   : > { %p999_p13 = scmp.ne.s32.totalorder %s1371_s14, %s998_s16  ;;  %p1006_p4 = scmp.lt.s32.totalorder %s1371_s14, %s1371_s14 }
  0x34   : > { %p1007_p7 = scmp.lt.s32.totalorder %s1005_s17, %s998_s16 }
  0x35   : > { %p1001_p3 = pnand %p999_p13, %p1386_p5 }
  0x36   : > { %p1008_p12 = por %p1007_p7, %p1006_p4 }
  0x37   : > { %p1002_p0 = pneg %p1001_p3 }
  0x39   : > { %p1009_p6 = pnand %p1008_p12, %p1002_p0 }
  0x3b   : > { %1012 = shalt.err (!%p1009_p6)
}
  0x3c   : > { %s1247_s21 = smov 128   ;;  %s1248_s27 = smov 8  }
  0x3d   : > { %866 = dma.hbm_to_vmem [thread:$0]  (!%p1366_p2), %s1747_s1, 256, %s1371_s14, %s1376_s15, %s1247_s21, %s1247_s21, %s1248_s27  }
  0x3e   : > { %p361_p13 = scmp.lt.s32.totalorder %s1244_s25, 3  ;;  %p1749_p12 = scmp.ge.s32.totalorder %s1244_s25, 1 }
  0x3f   : > { %s1249_s16 = smov [#allocation8]   ;;  %s1421_s28 = scalar_lea.sflag [#allocation9], %s267_s12 }
  0x40   : > { %p1415_p6 = pnand %p1749_p12, %p361_p13  ;;  %s329_s17 = sshll.u32 %s1249_s16, 4  ;;  %s330_s17 = int_to_ptr.vmem [resolvable:$true] %s329_s17 }
  0x41   : > { %s1013_s20 = scalar_lea.hbm %s1723_s3, 256 }
  0x42   : > { %s1750_s13 = scalar_select %p1415_p6, 1, 0 }
  0x43   : > { %p1014_p0 = scmp.ne.s32.totalorder %s1723_s3, %s1013_s20  ;;  %p1020_p9 = scmp.lt.u32.totalorder %s1013_s20, %s1013_s20 }
  0x44   : > { %p1022_p10 = scmp.lt.u32.totalorder %s1013_s20, %s1723_s3 }
  0x45   : > { %p1016_p3 = pnand %p1014_p0, %p1386_p5 }
  0x46   : > { %p1023_p11 = por %p1022_p10, %p1020_p9 }
  0x47   : > { %p1017_p8 = pneg %p1016_p3 }
  0x49   : > { %p1024_p1 = pnand %p1023_p11, %p1017_p8 }
  0x4b   : > { %1027 = shalt.err (!%p1024_p1)
}
  0x4c   : > { %s1028_s12 = scalar_lea.vmem %s330_s17, 256  ;;  %s1035_s24 = scalar_lea.vmem %s330_s17, 512 }
  0x4d   : > { %p1029_p4 = scmp.ne.s32.totalorder %s330_s17, %s1028_s12  ;;  %p1036_p12 = scmp.lt.s32.totalorder %s330_s17, %s330_s17 }
  0x4e   : > { %p1037_p6 = scmp.lt.s32.totalorder %s1035_s24, %s1028_s12 }
  0x4f   : > { %p1031_p7 = pnand %p1029_p4, %p1386_p5 }
  0x50   : > { %p1038_p2 = por %p1037_p6, %p1036_p12 }
  0x51   : > { %p1032_p13 = pneg %p1031_p7 }
  0x53   : > { %p1039_p0 = pnand %p1038_p2, %p1032_p13 }
  0x55   : > { %1042 = shalt.err (!%p1039_p0)
}
  0x56   : > { %p1751_p3 = scmp.ne.s32.totalorder %s1746_s11, 0  ;;  %s1250_s8 = smov [#allocation2]  }
  0x57   : > { %s257_s10 = sshll.u32 %s1250_s8, 4  ;;  %s1043_s14 = scalar_lea.hbm %s1720_s0, 256  ;;  %s258_s10 = int_to_ptr.vmem [resolvable:$true] %s257_s10 }
  0x58   : > { %872 = dma.hbm_to_vmem [thread:$0]  (!%p1751_p3), %s1723_s3, 256, %s330_s17, %s1421_s28, %s1247_s21, %s1247_s21, %s1248_s27  }
  0x59   : > { %p1044_p2 = scmp.ne.s32.totalorder %s1720_s0, %s1043_s14  ;;  %p1050_p9 = scmp.lt.u32.totalorder %s1043_s14, %s1043_s14 }
  0x5a   : > { %p1052_p10 = scmp.lt.u32.totalorder %s1043_s14, %s1720_s0 }
  0x5b   : > { %p1046_p6 = pnand %p1044_p2, %p1386_p5 }
  0x5c   : > { %p1053_p11 = por %p1052_p10, %p1050_p9 }
  0x5d   : > { %p1047_p8 = pneg %p1046_p6 }
  0x5f   : > { %p1054_p1 = pnand %p1053_p11, %p1047_p8 }
  0x61   : > { %1057 = shalt.err (!%p1054_p1)
}
  0x62   : > { %s1058_s17 = scalar_lea.vmem %s258_s10, 256  ;;  %s1065_s18 = scalar_lea.vmem %s258_s10, 512 }
  0x63   : > { %p1059_p4 = scmp.ne.s32.totalorder %s258_s10, %s1058_s17  ;;  %p1066_p12 = scmp.lt.s32.totalorder %s258_s10, %s258_s10 }
  0x64   : > { %p1067_p0 = scmp.lt.s32.totalorder %s1065_s18, %s1058_s17 }
  0x65   : > { %p1061_p7 = pnand %p1059_p4, %p1386_p5 }
  0x66   : > { %p1068_p3 = por %p1067_p0, %p1066_p12 }
  0x67   : > { %p1062_p13 = pneg %p1061_p7 }
  0x69   : > { %p1069_p2 = pnand %p1068_p3, %p1062_p13 }
  0x6b   : > { %1072 = shalt.err (!%p1069_p2)
}
  0x6c   : > { %p1752_p6 = scmp.ne.s32.totalorder %s1746_s11, 0  ;;  %s1251_s8 = smov [#allocation7]  }
  0x6d   : > { %s305_s7 = sshll.u32 %s1251_s8, 4  ;;  %s1073_s29 = scalar_lea.hbm %s1722_s2, 256  ;;  %s306_s7 = int_to_ptr.vmem [resolvable:$true] %s305_s7 }
  0x6e   : > { %863 = dma.hbm_to_vmem [thread:$0]  (!%p1752_p6), %s1720_s0, 256, %s258_s10, [#allocation3], %s1247_s21, %s1247_s21, %s1248_s27  }
  0x6f   : > { %p1074_p3 = scmp.ne.s32.totalorder %s1722_s2, %s1073_s29  ;;  %p1080_p10 = scmp.lt.u32.totalorder %s1073_s29, %s1073_s29 }
  0x70   : > { %p1082_p11 = scmp.lt.u32.totalorder %s1073_s29, %s1722_s2 }
  0x71   : > { %p1076_p8 = pnand %p1074_p3, %p1386_p5 }
  0x72   : > { %p1083_p1 = por %p1082_p11, %p1080_p10 }
  0x73   : > { %p1077_p9 = pneg %p1076_p8 }
  0x75   : > { %p1084_p4 = pnand %p1083_p1, %p1077_p9 }
  0x77   : > { %1087 = shalt.err (!%p1084_p4)
}
  0x78   : > { %s1088_s10 = scalar_lea.vmem %s306_s7, 256  ;;  %s1095_s1 = scalar_lea.vmem %s306_s7, 512 }
  0x79   : > { %p1089_p7 = scmp.ne.s32.totalorder %s306_s7, %s1088_s10  ;;  %p1096_p0 = scmp.lt.s32.totalorder %s306_s7, %s306_s7 }
  0x7a   : > { %p1097_p2 = scmp.lt.s32.totalorder %s1095_s1, %s1088_s10 }
  0x7b   : > { %p1091_p13 = pnand %p1089_p7, %p1386_p5 }
  0x7c   : > { %p1098_p6 = por %p1097_p2, %p1096_p0 }
  0x7d   : > { %p1092_p12 = pneg %p1091_p13 }
  0x7f   : > { %p1099_p3 = pnand %p1098_p6, %p1092_p12 }
  0x81   : > { %1102 = shalt.err (!%p1099_p3)
}
  0x82   : > { %p1753_p8 = scmp.ne.s32.totalorder %s1746_s11, 0  ;;  %s1252_s16 = smov [#allocation10]  }
  0x83   : > { %s353_s14 = sshll.u32 %s1252_s16, 4  ;;  %s1103_s24 = scalar_lea.hbm %s1724_s4, 256  ;;  %s354_s14 = int_to_ptr.vmem [resolvable:$true] %s353_s14 }
  0x84   : > { %869 = dma.hbm_to_vmem [thread:$0]  (!%p1753_p8), %s1722_s2, 256, %s306_s7, %s1376_s15, %s1247_s21, %s1247_s21, %s1248_s27  }
  0x85   : > { %p1104_p6 = scmp.ne.s32.totalorder %s1724_s4, %s1103_s24  ;;  %p1110_p11 = scmp.lt.u32.totalorder %s1103_s24, %s1103_s24 }
  0x86   : > { %p1112_p1 = scmp.lt.u32.totalorder %s1103_s24, %s1724_s4 }
  0x87   : > { %p1106_p9 = pnand %p1104_p6, %p1386_p5 }
  0x88   : > { %p1113_p4 = por %p1112_p1, %p1110_p11 }
  0x89   : > { %p1107_p10 = pneg %p1106_p9 }
  0x8b   : > { %p1114_p7 = pnand %p1113_p4, %p1107_p10 }
  0x8d   : > { %1117 = shalt.err (!%p1114_p7)
}
  0x8e   : > { %s1118_s15 = scalar_lea.vmem %s354_s14, 256  ;;  %s1125_s7 = scalar_lea.vmem %s354_s14, 512 }
  0x8f   : > { %p1119_p13 = scmp.ne.s32.totalorder %s354_s14, %s1118_s15  ;;  %p1126_p2 = scmp.lt.s32.totalorder %s354_s14, %s354_s14 }
  0x90   : > { %p1127_p3 = scmp.lt.s32.totalorder %s1125_s7, %s1118_s15 }
  0x91   : > { %p1121_p12 = pnand %p1119_p13, %p1386_p5 }
  0x92   : > { %p1128_p8 = por %p1127_p3, %p1126_p2 }
  0x93   : > { %p1122_p0 = pneg %p1121_p12 }
  0x95   : > { %p1129_p6 = pnand %p1128_p8, %p1122_p0 }
  0x97   : > { %1132 = shalt.err (!%p1129_p6)
}
  0x98   : > { %p1754_p9 = scmp.ne.s32.totalorder %s1746_s11, 0  ;;  %p1755_p10 = scmp.ne.s32.totalorder %s1750_s13, 0 }
  0x99   : > { %s367_s6 = sand.u32 (!%p1755_p10), 1, %s1232_s22   ;;  %p1756_p5 = scmp.ne.s32.totalorder (!%p1755_p10), %s1741_s30, 0 }
  0x9a   : > { %875 = dma.hbm_to_vmem [thread:$0]  (!%p1754_p9), %s1724_s4, 256, %s354_s14, %s1421_s28, %s1247_s21, %s1247_s21, %s1248_s27  }
  0x9b   : > { %365 = sbr.rel (%p1755_p10) target bundleno = 223 (0xdf), region = 40  ;;  %s1513_s16 = sshll.u32 (!%p1755_p10), %s367_s6, 4 }
  0x9c   : > { %s368_s29 = scalar_lea.sflag (!%p1755_p10), [#allocation3], %s367_s6  ;;  %s371_s12 = scalar_lea.vmem (!%p1755_p10), [#allocation2], %s1513_s16 }
  0xa2   : > { %1198 = dma.done.wait (%p1756_p5), %s368_s29, 256  }
  0xa3   : > { %1200 = vsyncadd (%p1756_p5), %s368_s29, 4294967040  ;;  %s376_s28 = sand.u32 1, %s1325_s26   ;;  %s380_s21 = scalar_lea.vmem [#allocation5], %s1513_s16 }
  0xa4   : > { %s377_s11 = scalar_lea.sflag [#allocation6], %s376_s28 }
  0xa5   : > { %1202 = dma.done.wait (%p1756_p5), %s377_s11, 512  }
  0xa6   : > { %1204 = vsyncadd (%p1756_p5), %s377_s11, 4294966784  ;;  %s389_s27 = scalar_lea.vmem [#allocation7], %s1513_s16  ;;  %s395_s13 = scalar_lea.sflag [#allocation9], %s376_s28 }
  0xa7   : > { %s398_s14 = scalar_lea.vmem [#allocation8], %s1513_s16 }
  0xa8   : > { %1206 = dma.done.wait (%p1756_p5), %s395_s13, 512  }
  0xa9   : > { %1208 = vsyncadd (%p1756_p5), %s395_s13, 4294966784  ;;  %s836_s26 = sshll.u32 %s1236_s23, 4  ;;  %v493_v0 = vlaneseq  ;;  %s451_s17 = sand.u32 1, %s1220_s19   ;;  %v1534_v4 = vld [vmem:[%s371_s12] sm:$0xff]  ;;  %v1536_v5 = vld [vmem:[%s371_s12 + $0x8] sm:$0xff] }
  0xaa   : > { %s488_s24 = ssub.s32 16, %s836_s26  ;;  %v1538_v6 = vld [vmem:[%s380_s21] sm:$0xff]  ;;  %v1548_v9 = vld [vmem:[%s380_s21 + $0x8] sm:$0xff]  ;;  %v516_v11 = vsub.f32 1.0, %v1534_v4  ;;  %v517_v12 = vsub.f32 1.0, %v1536_v5  ;;  %s835_s30 = sshll.u32 %s451_s17, 6 }
  0xab   : > { %v494_v1 = vshrl.u32 %v493_v0, 7  ;;  %v496_v3 = vstv %s488_s24  ;;  %v508_v10 = vmul.f32 %v1538_v6, %v1534_v4  ;;  %v1555_v13 = vsub.f32 1.0, %v1538_v6  ;;  %v527_v14 = vld [vmem:[%s389_s27] sm:$0xff]  ;;  %v528_v15 = vld [vmem:[%s389_s27 + $0x8] sm:$0xff]  ;;  %s407_s18 = scalar_lea.vmem [#allocation10], %s1513_s16  ;;  %s1579_s10 = scalar_lea.vmem [#allocation11], %s835_s30 }
  0xac   : > { %v509_v16 = vmul.f32 %v1548_v9, %v1536_v5  ;;  %v1560_v17 = vsub.f32 1.0, %v1548_v9  ;;  %959 = vlog2.f32 %v527_v14  ;;  %v535_v20 = vsub.f32 1.0, %v527_v14  ;;  %v561_v21 = vld [vmem:[%s398_s14] sm:$0xff]  ;;  %v562_v25 = vld [vmem:[%s398_s14 + $0x8] sm:$0xff]  ;;  %s847_s1 = sshll.u32 %s1236_s23, 10  ;;  %s643_s15 = sshll.u32 %s1579_s10, 4  ;;  %s1662_s15 = int_to_ptr.vmem [resolvable:$true] %s643_s15 }
  0xad   : > { %v495_v2 = vadd.s32 8, %v494_v1  ;;  %vm1540_vm0 = vcmp.lt.s32.totalorder %v494_v1, %v496_v3  ;;  %v520_v19 = vmul.f32 %v1555_v13, %v516_v11  ;;  %961 = vlog2.f32 %v528_v15  ;;  %v595_v30 = vld [vmem:[%s407_s18] sm:$0xff]  ;;  %v596_v33 = vld [vmem:[%s407_s18 + $0x8] sm:$0xff]  ;;  %s1660_s8 = scalar_lea.hbm %s1725_s5, %s847_s1  ;;  %s1668_s23 = scalar_lea.sflag [#allocation4], %s451_s17 }
  0xae   : > { %v510_v18 = vsel %vm1540_vm0, %v508_v10, 0.0  ;;  %v521_v23 = vmul.f32 %v1560_v17, %v517_v12  ;;  %v536_v24 = vsub.f32 1.0, %v528_v15  ;;  %963 = vlog2.f32 %v535_v20  ;;  %s1133_s6 = scalar_lea.vmem %s1662_s15, 1024  ;;  %p1769_p11 = scmp.ne.s32.totalorder %s1743_s9, 0 }
  0xaf   : > { %vm1544_vm1 = vcmp.lt.s32.totalorder %v495_v2, %v496_v3  ;;  %v522_v27 = vsel %vm1540_vm0, %v520_v19, 0.0  ;;  %v569_v29 = vsub.f32 1.0, %v561_v21  ;;  %v570_v32 = vsub.f32 1.0, %v562_v25  ;;  %p1134_p8 = scmp.ne.s32.totalorder %s1662_s15, %s1133_s6  ;;  %s1253_s16 = smov [#allocation11]  }
  0xb0   : > { %v511_v22 = vsel %vm1544_vm1, %v509_v16, 0.0  ;;  %v523_v28 = vsel %vm1544_vm1, %v521_v23, 0.0  ;;  %965 = vlog2.f32 %v536_v24  ;;  %v603_v34 = vsub.f32 1.0, %v595_v30  ;;  %s1137_s29 = sshll.u32 %s1253_s16, 4  ;;  %s1138_s29 = int_to_ptr.vmem [resolvable:$false] %s1137_s29 }
  0xb1   : > { %v512_v26 = vadd.f32 %v511_v22, %v510_v18  ;;  %v524_v31 = vadd.f32 %v523_v28, %v522_v27  ;;  %967 = vlog2.f32 %v561_v21  ;;  %v604_v35 = vsub.f32 1.0, %v596_v33  ;;  %p1135_p1 = pnand %p1134_p8, %p1769_p11  ;;  %s1139_s12 = scalar_lea.vmem %s1138_s29, 2048 }
  0xb2   : > { %969 = vlog2.f32 %v562_v25  ;;  %vm499_vm2 = vcmp.eq.f32.partialorder %v1534_v4, 1.0  ;;  %vm500_vm3 = vcmp.eq.f32.partialorder %v1536_v5, 1.0  ;;  %vm503_vm4 = vcmp.eq.f32.partialorder %v1534_v4, 0.0  ;;  %p1140_p7 = scmp.lt.s32.totalorder %s1662_s15, %s1138_s29  ;;  %p1141_p13 = scmp.lt.s32.totalorder %s1139_s12, %s1133_s6 }
  0xb3   : > { %514 = vst [vmem:[%s1579_s10] sm:$0xff] %v512_v26  ;;  %971 = vlog2.f32 %v569_v29  ;;  %526 = vst [vmem:[%s1579_s10 + $0x8] sm:$0xff] %v524_v31  ;;  %vm504_vm6 = vcmp.eq.f32.partialorder %v1536_v5, 0.0  ;;  %p1136_p4 = pneg %p1135_p1 }
  0xb4   : > { %973 = vlog2.f32 %v570_v32  ;;  %vm1589_vm5 = vmand %vm1540_vm0, %vm499_vm2  ;;  %p1142_p12 = por %p1141_p13, %p1140_p7 }
  0xb5   : > { %975 = vlog2.f32 %v595_v30  ;;  %vm1599_vm7 = vmand %vm1544_vm1, %vm500_vm3 }
  0xb6   : > { %977 = vlog2.f32 %v596_v33  ;;  %v960_v36 = vpop.eup %959  ;;  %vm1609_vm8 = vmand %vm1540_vm0, %vm503_vm4  ;;  %p1143_p0 = pnand %p1142_p12, %p1136_p4 }
  0xb7   : > { %979 = vlog2.f32 %v603_v34  ;;  %v962_v37 = vpop.eup %961  ;;  %v530_v38 = vmul.f32 0.6931472, %v960_v36  ;;  %vm1615_vm9 = vmand %vm1544_vm1, %vm504_vm6 }
  0xb8   : > { %981 = vlog2.f32 %v604_v35  ;;  %v964_v39 = vpop.eup %963  ;;  %v532_v40 = vmul.f32 0.6931472, %v962_v37 }
  0xb9   : > { %v533_v42 = vmax.f32 %v530_v38, -100.0  ;;  %v538_v43 = vmul.f32 0.6931472, %v964_v39 }
  0xba   : > { %v966_v41 = vpop.eup %965  ;;  %v534_v45 = vmax.f32 %v532_v40, -100.0 }
  0xbb   : > { %v968_v44 = vpop.eup %967  ;;  %v540_v46 = vmul.f32 0.6931472, %v966_v41  ;;  %v541_v48 = vmax.f32 %v538_v43, -100.0  ;;  %v543_v49 = vmul.f32 %v533_v42, %v1538_v6 }
  0xbc   : > { %v970_v47 = vpop.eup %969  ;;  %v564_v50 = vmul.f32 0.6931472, %v968_v44  ;;  %v544_v54 = vmul.f32 %v534_v45, %v1548_v9 }
  0xbd   : > { %v972_v51 = vpop.eup %971  ;;  %v542_v53 = vmax.f32 %v540_v46, -100.0  ;;  %v566_v55 = vmul.f32 0.6931472, %v970_v47  ;;  %v545_v58 = vmul.f32 %v541_v48, %v1555_v13 }
  0xbe   : > { %v974_v56 = vpop.eup %973  ;;  %v567_v59 = vmax.f32 %v564_v50, -100.0  ;;  %v572_v60 = vmul.f32 0.6931472, %v972_v51 }
  0xbf   : > { %v976_v61 = vpop.eup %975  ;;  %v546_v62 = vmul.f32 %v542_v53, %v1560_v17  ;;  %v568_v0 = vmax.f32 %v566_v55, -100.0  ;;  %v574_v1 = vmul.f32 0.6931472, %v974_v56  ;;  %v547_v3 = vadd.f32 %v545_v58, %v543_v49 }
  0xc0   : > { %v978_v2 = vpop.eup %977  ;;  %v575_v10 = vmax.f32 %v572_v60, -100.0  ;;  %v577_v11 = vmul.f32 %v567_v59, %v1538_v6  ;;  %v598_v4 = vmul.f32 0.6931472, %v976_v61 }
  0xc1   : > { %v980_v12 = vpop.eup %979  ;;  %v548_v7 = vadd.f32 %v546_v62, %v544_v54  ;;  %v576_v14 = vmax.f32 %v574_v1, -100.0  ;;  %v578_v15 = vmul.f32 %v568_v0, %v1548_v9  ;;  %v600_v16 = vmul.f32 0.6931472, %v978_v2 }
  0xc2   : > { %v982_v18 = vpop.eup %981  ;;  %v550_v19 = vsel %vm1589_vm5, %v547_v3, 0.0  ;;  %v556_v8 = vsel %vm1609_vm8, %v547_v3, 0.0  ;;  %v579_v20 = vmul.f32 %v575_v10, %v1555_v13  ;;  %v601_v21 = vmax.f32 %v598_v4, -100.0 }
  0xc3   : > { %v551_v22 = vsel %vm1599_vm7, %v548_v7, 0.0  ;;  %v557_v23 = vsel %vm1615_vm9, %v548_v7, 0.0  ;;  %v580_v24 = vmul.f32 %v576_v14, %v1560_v17  ;;  %v602_v25 = vmax.f32 %v600_v16, -100.0 }
  0xc4   : > { %v552_v26 = vadd.f32 %v551_v22, %v550_v19  ;;  %v558_v27 = vadd.f32 %v557_v23, %v556_v8  ;;  %v581_v28 = vadd.f32 %v579_v20, %v577_v11  ;;  %v606_v29 = vmul.f32 0.6931472, %v980_v12 }
  0xc5   : > { %v582_v30 = vadd.f32 %v580_v24, %v578_v15  ;;  %v608_v31 = vmul.f32 0.6931472, %v982_v18  ;;  %v611_v32 = vmul.f32 %v601_v21, %v1538_v6  ;;  %v612_v33 = vmul.f32 %v602_v25, %v1548_v9 }
  0xc6   : > { %v584_v34 = vsel %vm1589_vm5, %v581_v28, 0.0  ;;  %v590_v35 = vsel %vm1609_vm8, %v581_v28, 0.0  ;;  %v609_v38 = vmax.f32 %v606_v29, -100.0  ;;  %554 = vst [vmem:[%s1579_s10 + $0x10] sm:$0xff] %v552_v26  ;;  %560 = vst [vmem:[%s1579_s10 + $0x18] sm:$0xff] %v558_v27 }
  0xc7   : > { %v585_v36 = vsel %vm1599_vm7, %v582_v30, 0.0  ;;  %v591_v37 = vsel %vm1615_vm9, %v582_v30, 0.0  ;;  %v610_v6 = vmax.f32 %v608_v31, -100.0 }
  0xc8   : > { %v586_v9 = vadd.f32 %v585_v36, %v584_v34  ;;  %v592_v39 = vadd.f32 %v591_v37, %v590_v35  ;;  %v613_v40 = vmul.f32 %v609_v38, %v1555_v13 }
  0xc9   : > { %v614_v41 = vmul.f32 %v610_v6, %v1560_v17 }
  0xca   : > { %v615_v42 = vadd.f32 %v613_v40, %v611_v32  ;;  %588 = vst [vmem:[%s1579_s10 + $0x20] sm:$0xff] %v586_v9  ;;  %594 = vst [vmem:[%s1579_s10 + $0x28] sm:$0xff] %v592_v39 }
  0xcb   : > { %v616_v43 = vadd.f32 %v614_v41, %v612_v33 }
  0xcc   : > { %v618_v44 = vsel %vm1589_vm5, %v615_v42, 0.0  ;;  %v624_v13 = vsel %vm1609_vm8, %v615_v42, 0.0 }
  0xcd   : > { %v619_v45 = vsel %vm1599_vm7, %v616_v43, 0.0  ;;  %v625_v17 = vsel %vm1615_vm9, %v616_v43, 0.0 }
  0xce   : > { %v620_v46 = vadd.f32 %v619_v45, %v618_v44  ;;  %v626_v47 = vadd.f32 %v625_v17, %v624_v13 }
  0xd0   : > { %622 = vst [vmem:[%s1579_s10 + $0x30] sm:$0xff] %v620_v46  ;;  %628 = vst [vmem:[%s1579_s10 + $0x38] sm:$0xff] %v626_v47 }
  0xd1   : > { %1146 = shalt.err (!%p1143_p0)
}
  0xd2   : > { %s1147_s28 = scalar_lea.hbm %s1660_s8, 1024  ;;  %s1151_s27 = scalar_lea.hbm %s1725_s5, 2048 }
  0xd3   : > { %p1148_p2 = scmp.ne.s32.totalorder %s1660_s8, %s1147_s28  ;;  %p1152_p9 = scmp.lt.u32.totalorder %s1660_s8, %s1725_s5 }
  0xd4   : > { %p1153_p10 = scmp.lt.u32.totalorder %s1151_s27, %s1147_s28  ;;  %p1155_p8 = scmp.lt.u32.totalorder %s1147_s28, %s1660_s8 }
  0xd5   : > { %p1149_p3 = pnand %p1148_p2, %p1769_p11 }
  0xd6   : > { %p1154_p5 = por %p1153_p10, %p1152_p9 }
  0xd7   : > { %p1150_p6 = pneg %p1149_p3 }
  0xd8   : > { %p1156_p1 = por %p1155_p8, %p1154_p5 }
  0xda   : > { %p1157_p4 = pnand %p1156_p1, %p1150_p6 }
  0xdc   : > { %1160 = shalt.err (!%p1157_p4)
}
  0xdd   : > { %s1254_s26 = smov 128   ;;  %s1255_s24 = smov 8  }
  0xde   : > { %858 = dma.vmem_to_hbm [thread:$0]  (%p1769_p11), %s1662_s15, 1024, %s1660_s8, %s1668_s23, %s1254_s26, %s1254_s26, %s1255_s24  }
  0xdf PF: > { %s1770_s17 = sld [smem:[#allocation16_spill]]  ;;  %s1771_s30 = sld [smem:[#allocation21_spill]] }
  0xe0   : > { %p1773_p13 = scmp.ge.s32.totalorder %s1244_s25, 2 }
  0xe5   : > { %s658_s18 = sand.u32 1, %s1770_s17   ;;  %p1772_p7 = scmp.ne.s32.totalorder %s1771_s30, 0 }
  0xe6   : > { %s659_s10 = scalar_lea.sflag [#allocation4], %s658_s18 }
  0xe7   : > { %p877_p12 = pnand %p1773_p13, %p1772_p7 }
  0xe9   : > { %1210 = dma.done.wait (!%p877_p12), %s659_s10, 1024  }
  0xea   : > { %1212 = vsyncadd (!%p877_p12), %s659_s10, 4294966272  ;;  %s27_s25 = sadd.s32 1, %s1244_s25   ;;  %s1774_s1 = sld [smem:[#allocation17_spill]] }
  0xeb   : > { %p24_p0 = scmp.ge.s32.totalorder %s27_s25, 4   ;;  %s1775_s20 = sld [smem:[#allocation20_spill]] }
  0xec   : > { %s1776_s23 = sld [smem:[#allocation18_spill]]  ;;  %s1777_s24 = sld [smem:[#allocation19_spill]] }
  0xed   : > { %s1778_s18 = smov %s1220_s19  ;;  %s1780_s21 = smov %s1232_s22 }
  0xee   : > { %s1710_s22 = smov 0   ;;  %26 = sbr.rel (!%p24_p0) target bundleno = 13 (0xd), region = 137 }
  0xf0   : > { %s1779_s19 = smov %s1774_s1 }
  0xf5   :  { %664 = vsyncpa [#allocation3], 1 }
  0xf6   :  { %666 = vsyncpa [#allocation3 + $0x1], 1 }
  0xf7   :  { %667 = vsyncpa [#allocation6], 1 }
  0xf8   :  { %669 = vsyncpa [#allocation6 + $0x1], 1 }
  0xf9   :  { %670 = vsyncpa [#allocation9], 1 }
  0xfa   :  { %672 = vsyncpa [#allocation9 + $0x1], 1 }
  0xfb   :  { %673 = vsyncpa [#allocation4], 1 }
  0xfc   :  { %675 = vsyncpa [#allocation4 + $0x1], 1 }

</bundles_post_ra>
